<compile_context>
chip_gen: v7x
topology: tpu7x:2x2x1
jax: 0.10.0
libtpu: 0.0.40
codegen_flags: <defaults>
</compile_context>

<pallas_src>
import jax
import jax.numpy as jnp
from jax.experimental import pallas as pl
from jax.experimental.pallas import tpu as pltpu

_MiB = 1024 * 1024


def _same_copy_kernel(x_ref, o_ref):
    # `Same.forward` has no compute: identity copy of one lane-dense block.
    o_ref[...] = x_ref[...]


def _vmem_capacity_bytes() -> int:
    """Best-effort physical VMEM query; falls back to the smallest (v7x, 64 MiB)."""
    try:
        return int(pltpu.get_tpu_info().vmem_capacity_bytes)
    except Exception:
        return 64 * _MiB


def _pick_layout(total: int, itemsize: int):
    """Exact factorization total == rows * lanes with lanes % 128 == 0 and
    rows % sublane_pack == 0 (dtype-aware). No padding, no post-slice.
    Returns (rows, lanes, sublane_pack) or None if impossible."""
    sub = max(1, 32 // itemsize)  # f32 -> 8, bf16 -> 16, int8/fp8 -> 32 rows/packed tile
    for lanes in (2048, 1024, 512, 256, 128):
        if total % lanes == 0:
            rows = total // lanes
            if rows % sub == 0:
                return rows, lanes, sub
    return None


def _round_up(v: int, m: int) -> int:
    return -(-v // m) * m


def same_forward(x: jax.Array, *, force_pallas: bool = False) -> jax.Array:
    """Equivalent of torch `x.squeeze(0)`."""
    # torch squeeze(0) is a no-op when dim 0 != 1 -> return the array untouched.
    if x.ndim == 0 or x.shape[0] != 1:
        return x
    out_shape = x.shape[1:]

    # Production path: metadata-only squeeze -> zero-copy reshape. Fastest on
    # every generation; the kernel can never beat this.
    if not force_pallas:
        return x.reshape(out_shape)

    total = int(x.size)
    itemsize = jnp.dtype(x.dtype).itemsize
    layout = None if total == 0 else _pick_layout(total, itemsize)
    if layout is None:
        # No exact lane-dense factorization: never pad/slice just to run a copy.
        return x.reshape(out_shape)
    rows, lanes, sub = layout

    # Chip-aware block sizing: identity copy is HBM-bandwidth bound; bigger
    # blocks amortize the ~0.35 us/step grid overhead.
    vmem_cap = _vmem_capacity_bytes()
    target_block_bytes = 8 * _MiB if vmem_cap >= 96 * _MiB else 4 * _MiB

    tile_r = max(sub, (target_block_bytes // (lanes * itemsize)) // sub * sub)
    tile_r = min(tile_r, rows)
    # Keep >= 2 grid blocks when possible so "parallel" can use both v7x cores.
    if rows > sub:
        tile_r = min(tile_r, max(sub, _round_up(-(-rows // 2), sub)))
    # Make tile_r divide rows exactly (rows % sub == 0 guarantees termination),
    # so every block is a full, unmasked (sublane, lane)-aligned tile.
    while rows % tile_r != 0:
        tile_r -= sub

    tile_bytes = tile_r * lanes * itemsize
    # in + out, double-buffered = 4 x tile_bytes; leave headroom vs physical VMEM.
    vmem_limit = int(min(vmem_cap * 3 // 4, max(32 * _MiB, 6 * tile_bytes)))

    flat2d = x.reshape(rows, lanes)  # exact: rows * lanes == total

    out2d = pl.pallas_call(
        _same_copy_kernel,
        out_shape=jax.ShapeDtypeStruct((rows, lanes), x.dtype),
        grid_spec=pl.GridSpec(
            grid=(rows // tile_r,),
            in_specs=[pl.BlockSpec((tile_r, lanes), lambda i: (i, 0))],
            out_specs=pl.BlockSpec((tile_r, lanes), lambda i: (i, 0)),
        ),
        compiler_params=pltpu.CompilerParams(
            dimension_semantics=("parallel",),   # shards blocks across v7x's 2 TCs
            vmem_limit_bytes=vmem_limit,
        ),
    )(flat2d)

    return out2d.reshape(out_shape)


if __name__ == "__main__":
    key = jax.random.PRNGKey(0)

    # squeeze(0) targets a leading singleton batch dim (NCHW, batch = 1).
    x = jax.random.normal(key, (1, 4, 16, 16), dtype=jnp.float32)

    # Exercise the Pallas copy path once (forced past the no-kernel default).
    y = same_forward(x, force_pallas=True)
    jax.block_until_ready(y)
    ref = jnp.squeeze(x, axis=0)
    assert y.shape == (4, 16, 16), y.shape
    assert jnp.array_equal(y, ref), "mismatch vs reference squeeze"

    # Default (production) path: metadata-only reshape.
    y_fast = same_forward(x)
    assert jnp.array_equal(y_fast, ref)

    # Dtype-aware sublane tiling: bf16 path uses 16-row packed tiles.
    xb = jax.random.normal(key, (1, 8, 32, 32), dtype=jnp.bfloat16)
    yb = same_forward(xb, force_pallas=True)
    jax.block_until_ready(yb)
    assert yb.shape == (8, 32, 32)
    assert jnp.array_equal(yb, jnp.squeeze(xb, axis=0))

    # torch squeeze(0) no-op semantics when dim 0 != 1 (returns input as-is).
    x2 = jax.random.normal(key, (2, 4, 16, 16), dtype=jnp.float32)
    y2 = same_forward(x2, force_pallas=True)
    jax.block_until_ready(y2)
    assert y2.shape == x2.shape
    assert jnp.array_equal(y2, x2)

    print("KERNEL_OK")
</pallas_src>

<mosaic_0001>
module attributes {stable_mosaic.version = 11 : i64} {
  func.func @_same_copy_kernel(%arg0: i32, %arg1: memref<8x128xf32, #tpu.memory_space<vmem>>, %arg2: memref<8x128xf32, #tpu.memory_space<vmem>>) attributes {dimension_semantics = [#tpu.dimension_semantics<parallel>], iteration_bounds = array<i64: 1>, scalar_prefetch = 0 : i64, scratch_operands = 0 : i64, tpu.core_type = #tpu.core_type<tc>, window_params = [{transform_indices = @transform_0, window_bounds = array<i64: 8, 128>}, {transform_indices = @transform_1, window_bounds = array<i64: 8, 128>}]} {
    %c0 = arith.constant 0 : index
    %c0_0 = arith.constant 0 : index
    %0 = vector.load %arg1[%c0, %c0_0] : memref<8x128xf32, #tpu.memory_space<vmem>>, vector<8x128xf32>
    %c0_1 = arith.constant 0 : index
    %c0_2 = arith.constant 0 : index
    %1 = vector.load %arg2[%c0_1, %c0_2] : memref<8x128xf32, #tpu.memory_space<vmem>>, vector<8x128xf32>
    tpu.vector_store %arg2[%c0_1, %c0_2], %0 {strides = array<i32>} : memref<8x128xf32, #tpu.memory_space<vmem>>, vector<8x128xf32>,
    return
  }
  func.func @transform_0(%arg0: i32) -> (i32, i32) {
    %c0_i32 = arith.constant 0 : i32
    %c0_i32_0 = arith.constant 0 : i32
    return %arg0, %c0_i32 : i32, i32
  }
  func.func @transform_1(%arg0: i32) -> (i32, i32) {
    %c0_i32 = arith.constant 0 : i32
    %c0_i32_0 = arith.constant 0 : i32
    return %arg0, %c0_i32 : i32, i32
  }
}

</mosaic_0001>

<bundles_post_ra>
// kernel: tpu_custom_call.1
= control target key start
LH: loop header
LB: loop body
LE: loop exit
PB: predicated region body
PF: predicated region fallthrough
CT: control target
= control target key end

     0   :  { %6 = vsyncpa [#allocation3], 0  ;;  %s124_s0 = inlined_call_operand.hbm [shape: f32[8,128], index: 0, kind: input, shape index: {}]   ;;  %s125_s1 = inlined_call_operand.hbm [shape: f32[8,128], index: 1, kind: output, shape index: {}]  }
   0x1   :  { %7 = vsyncpa [#allocation4], 0  ;;  %s88_s6 = smov [#allocation2]   ;;  %s40_s10 = scalar_lea.hbm %s124_s0, 128 }
   0x2   :  { %s14_s7 = sshll.u32 %s88_s6, 4  ;;  %p41_p0 = scmp.ne.s32.totalorder %s124_s0, %s40_s10  ;;  %s15_s7 = int_to_ptr.vmem [resolvable:$true] %s14_s7 }
   0x3   :  { %p44_p1 = scmp.lt.u32.totalorder %s40_s10, %s124_s0 }
   0x5   :  { %p46_p2 = pnand %p44_p1, %p41_p0 }
   0x7   :  { %49 = shalt.err (!%p46_p2)
}
   0x8   :  { %s50_s15 = scalar_lea.vmem %s15_s7, 128  ;;  %p55_p4 = scmp.lt.s32.totalorder %s15_s7, %s15_s7 }
   0x9   :  { %p51_p3 = scmp.ne.s32.totalorder %s15_s7, %s50_s15  ;;  %p56_p5 = scmp.lt.s32.totalorder %s50_s15, %s50_s15 }
   0xb   :  { %p57_p6 = por %p56_p5, %p55_p4 }
   0xd   :  { %p58_p7 = pnand %p57_p6, %p51_p3 }
   0xf   :  { %61 = shalt.err (!%p58_p7)
}
  0x10   :  { %17 = dma.hbm_to_vmem [thread:$0]  %s124_s0, 128, %s15_s7, [#allocation3]  }
  0x11   :  { %84 = dma.done.wait [#allocation3], 128  }
  0x12   :  { %85 = vsyncadd [#allocation3], 4294967168  ;;  %s89_s18 = smov [#allocation5]   ;;  %v21_v0 = vld [vmem:[#allocation2] sm:$0xff] }
  0x13   :  { %s29_s19 = sshll.u32 %s89_s18, 4  ;;  %22 = vst [vmem:[#allocation5] sm:$0xff] %v21_v0  ;;  %s30_s19 = int_to_ptr.vmem [resolvable:$true] %s29_s19 }
  0x14   :  { %s62_s20 = scalar_lea.vmem %s30_s19, 128  ;;  %p67_p9 = scmp.lt.s32.totalorder %s30_s19, %s30_s19 }
  0x15   :  { %p63_p8 = scmp.ne.s32.totalorder %s30_s19, %s62_s20  ;;  %p68_p10 = scmp.lt.s32.totalorder %s62_s20, %s62_s20 }
  0x17   :  { %p69_p11 = por %p68_p10, %p67_p9 }
  0x19   :  { %p70_p12 = pnand %p69_p11, %p63_p8 }
  0x1b   :  { %73 = shalt.err (!%p70_p12)
}
  0x1c   :  { %s74_s23 = scalar_lea.hbm %s125_s1, 128 }
  0x1d   :  { %p75_p13 = scmp.ne.s32.totalorder %s125_s1, %s74_s23  ;;  %p78_p0 = scmp.lt.u32.totalorder %s74_s23, %s125_s1 }
  0x1f   :  { %p80_p1 = pnand %p78_p0, %p75_p13 }
  0x21   :  { %83 = shalt.err (!%p80_p1)
}
  0x22   :  { %32 = dma.vmem_to_hbm [thread:$0]  %s30_s19, 128, %s125_s1, [#allocation4]  }
  0x23   :  { %86 = dma.done.wait [#allocation4], 128  }
  0x24   :  { %87 = vsyncadd [#allocation4], 4294967168 }
  0x25   :  { %36 = vsyncpa [#allocation3], 1 }
  0x26   :  { %37 = vsyncpa [#allocation4], 1 }

</bundles_post_ra>
